<compile_context>
chip_gen: v5e
topology: v5e:2x2
jax: 0.10.0
libtpu: 0.0.40
codegen_flags: <defaults>
</compile_context>

<pallas_src>
import functools
import math

import jax
import jax.numpy as jnp
from jax.experimental import pallas as pl
from jax.experimental.pallas import tpu as pltpu


_LANE = 128                 # TPU lane width: last dims padded to multiples of this.
_TILE_GRAN = 512            # pad N up to a multiple of this so tiles never collapse.
_MAX_TILE = 1024            # largest adj row/col tile (review: 512 -> 1024).

# VMEM budgeting (bytes).  v7x has 64 MiB/TC physical VMEM (v5e/v6e: 128 MiB), so the
# scoped limit is capped at 48 MiB and the "keep h resident" decision keeps the whole
# working set (including double buffers) under 40 MiB -- safe on every generation
# while still admitting the 1024-tile + resident-h configuration.
_VMEM_SLACK = 4 * 1024 * 1024
_VMEM_LIMIT_FLOOR = 32 * 1024 * 1024
_VMEM_LIMIT_CAP = 48 * 1024 * 1024
_RESIDENT_H_BUDGET = 40 * 1024 * 1024


def _round_up(x, m):
    return ((x + m - 1) // m) * m


def _pad2d(a, rows, cols):
    return jnp.pad(a, ((0, rows - a.shape[0]), (0, cols - a.shape[1])))


def _plan_tiles(n):
    """Pick (n_pad, tm, tk) for an (n, n) adjacency.

    * n is padded to a multiple of _TILE_GRAN (just 128 for tiny graphs) so an
      unlucky N can never force the tile down to 128 (~29% of HBM roofline vs ~85%+
      at 512/1024).  Extra zero rows/cols are inert.
    * tk (reduction / lane axis of the adj tile) is the largest of {1024,512,256,128}
      dividing n_pad.
    * tm (row tile) is likewise as large as possible but capped at n_pad // 2 so the
      parallel row axis has >= 2 tiles whenever the graph allows it (v7x megacore).
    """
    n_pad = _round_up(n, _LANE)
    if n_pad > _TILE_GRAN:
        n_pad = _round_up(n_pad, _TILE_GRAN)

    def _largest_tile(cap):
        for t in (_MAX_TILE, 512, 256, _LANE):
            if t <= cap and n_pad % t == 0:
                return t
        return n_pad

    tk = _largest_tile(min(_MAX_TILE, n_pad))
    tm_cap = n_pad if n_pad < 2 * _LANE else n_pad // 2
    tm = _largest_tile(min(_MAX_TILE, tm_cap))
    return n_pad, tm, tk


def _clamp_vmem_limit(needed):
    return int(min(max(needed + _VMEM_SLACK, _VMEM_LIMIT_FLOOR), _VMEM_LIMIT_CAP))


# --------------------------------------------------------------------------- kernels


def _gcn_transform_kernel(x_ref, w_ref, out_ref):
    """out = x @ W (row-tiled).  Only used when the FIRST layer is reassociated."""
    out_ref[...] = jnp.dot(
        x_ref[...], w_ref[...], preferred_element_type=jnp.float32
    ).astype(out_ref.dtype)


def _gcn_aggregate_kernel(*refs, apply_relu, has_pre_w, has_post_w, h_resident, tk):
    """One fused GCN layer on a (tm, tk) tile of adj.

    acc[i] += adj[i, k] @ h[k]          for every k        (f32 accumulator)
    on the last k step (epilogue, under pl.when):
        r = acc @ W_pre      # this layer's weight, if NOT reassociated
        r = relu(r)          # ReLU in f32
        r = r @ W_post       # NEXT layer's weight (reassociated), fused epilogue
        out[i] = r
    """
    it = iter(refs)
    adj_ref = next(it)
    h_ref = next(it)
    pre_w_ref = next(it) if has_pre_w else None
    post_w_ref = next(it) if has_post_w else None
    out_ref = next(it)
    acc_ref = next(it)

    k = pl.program_id(1)

    @pl.when(k == 0)
    def _init():
        acc_ref[...] = jnp.zeros_like(acc_ref)

    if h_resident:
        # h holds all n_pad rows in VMEM (fetched once per pallas_call because its
        # block index is constant); take this step's tk-row chunk.
        start = pl.multiple_of(k * tk, tk)
        h_blk = h_ref[pl.ds(start, tk), :]
    else:
        h_blk = h_ref[...]

    acc_ref[...] += jnp.dot(adj_ref[...], h_blk, preferred_element_type=jnp.float32)

    @pl.when(k == pl.num_programs(1) - 1)
    def _finalize():
        r = acc_ref[...]
        if has_pre_w:
            w = pre_w_ref[...]
            r = jnp.dot(r.astype(w.dtype), w, preferred_element_type=jnp.float32)
        if apply_relu:
            r = jnp.maximum(r, 0.0)
        if has_post_w:
            w = post_w_ref[...]
            r = jnp.dot(r.astype(w.dtype), w, preferred_element_type=jnp.float32)
        out_ref[...] = r.astype(out_ref.dtype)


# -------------------------------------------------------------------------- wrappers


def gcn_transform(x_p, w_p, out_dtype, tm):
    """xw = x @ W as a row-tiled Pallas call (pre-pass for a reassociated layer 0)."""
    n_pad, a = x_p.shape
    b = w_p.shape[1]
    needed = (2 * tm * a * x_p.dtype.itemsize
              + 2 * a * b * w_p.dtype.itemsize
              + 2 * tm * b * jnp.dtype(out_dtype).itemsize)
    return pl.pallas_call(
        _gcn_transform_kernel,
        out_shape=jax.ShapeDtypeStruct((n_pad, b), out_dtype),
        grid_spec=pltpu.PrefetchScalarGridSpec(
            num_scalar_prefetch=0,
            grid=(n_pad // tm,),
            in_specs=[
                pl.BlockSpec((tm, a), lambda i: (i, 0)),
                pl.BlockSpec((a, b), lambda i: (0, 0)),
            ],
            out_specs=pl.BlockSpec((tm, b), lambda i: (i, 0)),
        ),
        compiler_params=pltpu.CompilerParams(
            dimension_semantics=("parallel",),
            vmem_limit_bytes=_clamp_vmem_limit(needed),
        ),
    )(x_p, w_p)


def gcn_aggregate(adj_p, h_p, pre_w, post_w, apply_relu, out_dtype, tm, tk):
    """out = epilogue(adj @ h) with the epilogue described in _gcn_aggregate_kernel."""
    n_pad = adj_p.shape[0]
    a = h_p.shape[1]
    cd = adj_p.dtype.itemsize
    out_itm = jnp.dtype(out_dtype).itemsize

    out_w = a
    if pre_w is not None:
        out_w = pre_w.shape[1]
    if post_w is not None:
        out_w = post_w.shape[1]

    w_bytes = sum(2 * w.size * w.dtype.itemsize
                  for w in (pre_w, post_w) if w is not None)

    def working_set(tm_, h_rows):
        return (2 * tm_ * tk * cd                      # adj tile, double-buffered
                + 2 * h_rows * a * h_p.dtype.itemsize  # h (resident or streamed)
                + tm_ * a * 4                          # f32 accumulator scratch
                + 2 * tm_ * out_w * out_itm            # output tile, double-buffered
                + w_bytes)                             # folded weights

    # Rare: very wide feature dims can blow the cap even when streaming h; shrink tm
    # (halving preserves divisibility into n_pad).
    while working_set(tm, tk) > _VMEM_LIMIT_CAP - _VMEM_SLACK and tm > _LANE:
        tm //= 2

    # Keep the full activation resident in VMEM when it fits: removes all repeated
    # h DMA (previously h was re-streamed once per row tile).
    h_resident = working_set(tm, n_pad) <= _RESIDENT_H_BUDGET
    needed = working_set(tm, n_pad if h_resident else tk)

    operands = [adj_p, h_p]
    in_specs = [
        pl.BlockSpec((tm, tk), lambda i, k: (i, k)),
        (pl.BlockSpec((n_pad, a), lambda i, k: (0, 0)) if h_resident
         else pl.BlockSpec((tk, a), lambda i, k: (k, 0))),
    ]
    if pre_w is not None:
        operands.append(pre_w)
        in_specs.append(pl.BlockSpec(pre_w.shape, lambda i, k: (0, 0)))
    if post_w is not None:
        operands.append(post_w)
        in_specs.append(pl.BlockSpec(post_w.shape, lambda i, k: (0, 0)))

    kernel = functools.partial(
        _gcn_aggregate_kernel,
        apply_relu=apply_relu,
        has_pre_w=pre_w is not None,
        has_post_w=post_w is not None,
        h_resident=h_resident,
        tk=tk,
    )
    return pl.pallas_call(
        kernel,
        out_shape=jax.ShapeDtypeStruct((n_pad, out_w), out_dtype),
        grid_spec=pltpu.PrefetchScalarGridSpec(
            num_scalar_prefetch=0,
            grid=(n_pad // tm, n_pad // tk),           # reduction axis (k) last
            in_specs=in_specs,
            out_specs=pl.BlockSpec((tm, out_w), lambda i, k: (i, 0)),
            scratch_shapes=[pltpu.VMEM((tm, a), jnp.float32)],
        ),
        compiler_params=pltpu.CompilerParams(
            dimension_semantics=("parallel", "arbitrary"),
            vmem_limit_bytes=_clamp_vmem_limit(needed),
        ),
    )(*operands)


# ---- plain-jnp executors with the *same* math / cast points (for verification) ----


def _transform_jnp(x_p, w_p, out_dtype):
    return jnp.dot(x_p, w_p, preferred_element_type=jnp.float32).astype(out_dtype)


def _aggregate_jnp(adj_p, h_p, pre_w, post_w, apply_relu, out_dtype):
    r = jnp.dot(adj_p, h_p, preferred_element_type=jnp.float32)
    if pre_w is not None:
        r = jnp.dot(r.astype(pre_w.dtype), pre_w, preferred_element_type=jnp.float32)
    if apply_relu:
        r = jnp.maximum(r, 0.0)
    if post_w is not None:
        r = jnp.dot(r.astype(post_w.dtype), post_w, preferred_element_type=jnp.float32)
    return r.astype(out_dtype)


# ------------------------------------------------------------------------ module API


def xavier_normal(key, in_features, out_features, gain=1.414):
    """Deterministic equivalent of nn.init.xavier_normal_(gain=1.414)."""
    std = gain * math.sqrt(2.0 / (in_features + out_features))
    return std * jax.random.normal(key, (in_features, out_features), dtype=jnp.float32)


def init_meta_gcn_params(key, n_feat, n_classes, ch_list=None):
    ch_list = ch_list or [n_feat, 256, 128]
    keys = jax.random.split(key, len(ch_list))
    params = {}
    for i in range(len(ch_list) - 1):
        params[f"gconv_{i}"] = xavier_normal(keys[i], ch_list[i], ch_list[i + 1])
    params["lin"] = xavier_normal(keys[-1], ch_list[-1], n_classes)
    return params


def prepare_adjacency(adj, compute_dtype=jnp.bfloat16):
    """Pad + cast adj once.  Hoist this out of the per-step path in a training loop;
    meta_gcn_forward detects a prepared adjacency and skips the N^2 pad/cast."""
    n_pad, _, _ = _plan_tiles(adj.shape[0])
    return _pad2d(adj, n_pad, n_pad).astype(compute_dtype)


def meta_gcn_forward(adj, x, params, num_gconvs, multilabel=False,
                     compute_dtype=jnp.bfloat16, use_pallas=True):
    """MetaGCN.forward with reassociated, tiled, bf16/f32-accumulate Pallas layers."""
    n = x.shape[0]
    n_pad, tm, tk = _plan_tiles(n)

    weights = [params[f"gconv_{i}"] for i in range(num_gconvs)] + [params["lin"]]
    relus = [True] * num_gconvs + [False]
    n_classes = weights[-1].shape[1]
    num_layers = len(weights)

    # adj may already be padded/cast by prepare_adjacency() (hoisted out of the loop).
    if adj.shape == (n_pad, n_pad) and adj.dtype == jnp.dtype(compute_dtype):
        adj_p = adj
    else:
        adj_p = _pad2d(adj, n_pad, n_pad).astype(compute_dtype)

    # -------- pad everything else to 128-lane shapes; zeros are inert.
    f0_pad = _round_up(weights[0].shape[0], _LANE)
    t = _pad2d(x, n_pad, f0_pad).astype(compute_dtype)
    w_p = [
        _pad2d(w, _round_up(w.shape[0], _LANE),
               _round_up(w.shape[1], _LANE)).astype(compute_dtype)
        for w in weights
    ]

    # -------- reassociation plan: 'B' = adj @ (h @ W) (output width <= input width),
    #          'A' = (adj @ h) @ W (widening layer keeps the original order).
    modes = ["B" if w.shape[1] <= w.shape[0] else "A" for w in w_p]

    if use_pallas:
        transform = functools.partial(gcn_transform, tm=tm)
        aggregate = functools.partial(gcn_aggregate, tm=tm, tk=tk)
    else:
        transform = _transform_jnp
        aggregate = _aggregate_jnp

    if modes[0] == "B":
        # First layer reassociated: fold W_0 into the features up front.
        t = transform(t, w_p[0], compute_dtype)

    for i in range(num_layers):
        pre_w = w_p[i] if modes[i] == "A" else None
        # If the NEXT layer is reassociated, fuse its weight into this layer's
        # epilogue so the wide activation never round-trips through HBM.
        post_w = w_p[i + 1] if (i + 1 < num_layers and modes[i + 1] == "B") else None
        out_dtype = jnp.float32 if i == num_layers - 1 else compute_dtype
        t = aggregate(adj_p, t, pre_w, post_w, relus[i], out_dtype)

    out = t[:n, :n_classes]
    if multilabel:
        out = jax.nn.sigmoid(out)  # glue; multilabel=False by default
    return out


if __name__ == "__main__":
    def run_case(seed, n_nodes, n_feat, n_classes, ch_list):
        key = jax.random.PRNGKey(seed)
        k_adj, k_x, k_params = jax.random.split(key, 3)

        # Symmetric, row-normalized dense adjacency (with self loops).
        a = jax.random.uniform(k_adj, (n_nodes, n_nodes), dtype=jnp.float32)
        a = 0.5 * (a + a.T) + jnp.eye(n_nodes, dtype=jnp.float32)
        adj = a / jnp.sum(a, axis=1, keepdims=True)

        x = jax.random.normal(k_x, (n_nodes, n_feat), dtype=jnp.float32)
        params = init_meta_gcn_params(k_params, n_feat, n_classes, ch_list)
        num_gconvs = len(ch_list) - 1

        # Hoisted pad + bf16 cast of adj (reused across steps in a training loop).
        adj_prepared = prepare_adjacency(adj)

        out = meta_gcn_forward(adj_prepared, x, params, num_gconvs, multilabel=False)
        out = jax.block_until_ready(out)
        assert out.shape == (n_nodes, n_classes)
        assert out.dtype == jnp.float32

        # (1) Same plan executed with plain jnp ops and identical dtype cast points:
        #     should match the Pallas kernels to accumulation-order noise.
        ref_matched = meta_gcn_forward(adj, x, params, num_gconvs, use_pallas=False)
        assert jnp.allclose(out, ref_matched, atol=1e-2, rtol=1e-2), (
            float(jnp.max(jnp.abs(out - ref_matched))))

        # (2) Pure-f32, original-association (PyTorch-order) reference: semantic check.
        ref = x
        for i in range(num_gconvs):
            ref = jnp.maximum(adj @ ref @ params[f"gconv_{i}"], 0.0)
        ref = adj @ ref @ params["lin"]
        assert jnp.allclose(out, ref, atol=5e-2, rtol=5e-2), (
            float(jnp.max(jnp.abs(out - ref))))

    # Module defaults: N=8 nodes, ch_list=[16, 256, 128], 4 classes (single tile).
    run_case(0, n_nodes=8, n_feat=16, n_classes=4, ch_list=[16, 256, 128])
    # Multi-tile grid (n_pad=384 -> 3x3), resident-h slicing, and the reassociated
    # first layer (gcn_transform) path.
    run_case(1, n_nodes=300, n_feat=300, n_classes=7, ch_list=[300, 256, 128])

    print("KERNEL_OK")
</pallas_src>

<mosaic_0001>
module attributes {stable_mosaic.version = 11 : i64} {
  func.func @_gcn_aggregate_kernel(%arg0: i32, %arg1: i32, %arg2: memref<128x128xbf16, #tpu.memory_space<vmem>>, %arg3: memref<128x128xbf16, #tpu.memory_space<vmem>>, %arg4: memref<128x256xbf16, #tpu.memory_space<vmem>>, %arg5: memref<256x128xbf16, #tpu.memory_space<vmem>>, %arg6: memref<128x128xbf16, #tpu.memory_space<vmem>>, %arg7: memref<128x128xf32, #tpu.memory_space<vmem>>) attributes {dimension_semantics = [#tpu.dimension_semantics<parallel>, #tpu.dimension_semantics<arbitrary>], iteration_bounds = array<i64: 1, 1>, scalar_prefetch = 0 : i64, scratch_operands = 1 : i64, tpu.core_type = #tpu.core_type<tc>, window_params = [{transform_indices = @transform_0, window_bounds = array<i64: 128, 128>}, {pipeline_mode = #tpu.pipeline_mode<synchronous>, transform_indices = @transform_1, window_bounds = array<i64: 128, 128>}, {pipeline_mode = #tpu.pipeline_mode<synchronous>, transform_indices = @transform_2, window_bounds = array<i64: 128, 256>}, {pipeline_mode = #tpu.pipeline_mode<synchronous>, transform_indices = @transform_3, window_bounds = array<i64: 256, 128>}, {transform_indices = @transform_4, window_bounds = array<i64: 128, 128>}]} {
    %c0_i32 = arith.constant 0 : i32
    %0 = arith.cmpi eq, %arg1, %c0_i32 : i32
    %1 = arith.extui %0 : i1 to i32
    %c0_i32_0 = arith.constant 0 : i32
    %2 = arith.cmpi ne, %1, %c0_i32_0 : i32
    scf.if %2 {
      %cst_9 = arith.constant 0.000000e+00 : f32
      %15 = vector.broadcast %cst_9 : f32 to vector<128x128xf32>
      %c0_10 = arith.constant 0 : index
      %c0_11 = arith.constant 0 : index
      %16 = vector.load %arg7[%c0_10, %c0_11] : memref<128x128xf32, #tpu.memory_space<vmem>>, vector<128x128xf32>
      tpu.vector_store %arg7[%c0_10, %c0_11], %15 {strides = array<i32>} : memref<128x128xf32, #tpu.memory_space<vmem>>, vector<128x128xf32>,
    } else {
    }
    %c128_i32 = arith.constant 128 : i32
    %3 = arith.muli %arg1, %c128_i32 : i32
    %4 = tpu.assume_multiple %3, 128 : i32
    %5 = arith.index_cast %4 : i32 to index
    %c0 = arith.constant 0 : index
    %6 = vector.load %arg3[%5, %c0] : memref<128x128xbf16, #tpu.memory_space<vmem>>, vector<128x128xbf16>
    %c0_1 = arith.constant 0 : index
    %c0_2 = arith.constant 0 : index
    %7 = vector.load %arg7[%c0_1, %c0_2] : memref<128x128xf32, #tpu.memory_space<vmem>>, vector<128x128xf32>
    %c0_3 = arith.constant 0 : index
    %c0_4 = arith.constant 0 : index
    %8 = vector.load %arg2[%c0_3, %c0_4] : memref<128x128xbf16, #tpu.memory_space<vmem>>, vector<128x128xbf16>
    %cst = arith.constant dense<0.000000e+00> : vector<128x128xf32>
    %9 = tpu.matmul %8, %6, %cst {dimension_numbers = #tpu.dot_dimension_numbers<[1], [0], [0], [1], [0, 0, 1, 1], [], []>} : vector<128x128xbf16>, vector<128x128xbf16>, vector<128x128xf32> -> vector<128x128xf32>
    %10 = arith.addf %7, %9 : vector<128x128xf32>
    %c0_5 = arith.constant 0 : index
    %c0_6 = arith.constant 0 : index
    %11 = vector.load %arg7[%c0_5, %c0_6] : memref<128x128xf32, #tpu.memory_space<vmem>>, vector<128x128xf32>
    tpu.vector_store %arg7[%c0_5, %c0_6], %10 {strides = array<i32>} : memref<128x128xf32, #tpu.memory_space<vmem>>, vector<128x128xf32>,
    %c0_i32_7 = arith.constant 0 : i32
    %12 = arith.cmpi eq, %arg1, %c0_i32_7 : i32
    %13 = arith.extui %12 : i1 to i32
    %c0_i32_8 = arith.constant 0 : i32
    %14 = arith.cmpi ne, %13, %c0_i32_8 : i32
    scf.if %14 {
      %c0_9 = arith.constant 0 : index
      %c0_10 = arith.constant 0 : index
      %15 = vector.load %arg7[%c0_9, %c0_10] : memref<128x128xf32, #tpu.memory_space<vmem>>, vector<128x128xf32>
      %c0_11 = arith.constant 0 : index
      %c0_12 = arith.constant 0 : index
      %16 = vector.load %arg4[%c0_11, %c0_12] : memref<128x256xbf16, #tpu.memory_space<vmem>>, vector<128x256xbf16>
      %17 = arith.truncf %15 : vector<128x128xf32> to vector<128x128xbf16>
      %cst_13 = arith.constant dense<0.000000e+00> : vector<128x256xf32>
      %18 = tpu.matmul %17, %16, %cst_13 {dimension_numbers = #tpu.dot_dimension_numbers<[1], [0], [0], [1], [0, 0, 1, 1], [], []>} : vector<128x128xbf16>, vector<128x256xbf16>, vector<128x256xf32> -> vector<128x256xf32>
      %cst_14 = arith.constant 0.000000e+00 : f32
      %19 = vector.broadcast %cst_14 : f32 to vector<128x256xf32>
      %20 = arith.maximumf %18, %19 : vector<128x256xf32>
      %c0_15 = arith.constant 0 : index
      %c0_16 = arith.constant 0 : index
      %21 = vector.load %arg5[%c0_15, %c0_16] : memref<256x128xbf16, #tpu.memory_space<vmem>>, vector<256x128xbf16>
      %22 = arith.truncf %20 : vector<128x256xf32> to vector<128x256xbf16>
      %cst_17 = arith.constant dense<0.000000e+00> : vector<128x128xf32>
      %23 = tpu.matmul %22, %21, %cst_17 {dimension_numbers = #tpu.dot_dimension_numbers<[1], [0], [0], [1], [0, 0, 1, 1], [], []>} : vector<128x256xbf16>, vector<256x128xbf16>, vector<128x128xf32> -> vector<128x128xf32>
      %24 = arith.truncf %23 : vector<128x128xf32> to vector<128x128xbf16>
      %c0_18 = arith.constant 0 : index
      %c0_19 = arith.constant 0 : index
      %25 = vector.load %arg6[%c0_18, %c0_19] : memref<128x128xbf16, #tpu.memory_space<vmem>>, vector<128x128xbf16>
      tpu.vector_store %arg6[%c0_18, %c0_19], %24 {strides = array<i32>} : memref<128x128xbf16, #tpu.memory_space<vmem>>, vector<128x128xbf16>,
    } else {
    }
    return
  }
  func.func @transform_0(%arg0: i32, %arg1: i32) -> (i32, i32) {
    %c0_i32 = arith.constant 0 : i32
    return %arg0, %arg1 : i32, i32
  }
  func.func @transform_1(%arg0: i32, %arg1: i32) -> (i32, i32) {
    %c0_i32 = arith.constant 0 : i32
    %c0_i32_0 = arith.constant 0 : i32
    %c0_i32_1 = arith.constant 0 : i32
    return %c0_i32, %c0_i32_0 : i32, i32
  }
  func.func @transform_2(%arg0: i32, %arg1: i32) -> (i32, i32) {
    %c0_i32 = arith.constant 0 : i32
    %c0_i32_0 = arith.constant 0 : i32
    %c0_i32_1 = arith.constant 0 : i32
    return %c0_i32, %c0_i32_0 : i32, i32
  }
  func.func @transform_3(%arg0: i32, %arg1: i32) -> (i32, i32) {
    %c0_i32 = arith.constant 0 : i32
    %c0_i32_0 = arith.constant 0 : i32
    %c0_i32_1 = arith.constant 0 : i32
    return %c0_i32, %c0_i32_0 : i32, i32
  }
  func.func @transform_4(%arg0: i32, %arg1: i32) -> (i32, i32) {
    %c0_i32 = arith.constant 0 : i32
    %c0_i32_0 = arith.constant 0 : i32
    return %arg0, %c0_i32 : i32, i32
  }
}

</mosaic_0001>

<bundles_post_ra>
// kernel: tpu_custom_call.1
= control target key start
LH: loop header
LB: loop body
LE: loop exit
PB: predicated region body
PF: predicated region fallthrough
CT: control target
= control target key end

     0   :  { %9 = vsyncpa [#allocation4], 0  ;;  %s1390_s0 = inlined_call_operand.hbm [shape: bf16[128,128], index: 0, kind: input, shape index: {}]   ;;  %s1391_s1 = inlined_call_operand.hbm [shape: bf16[128,128], index: 1, kind: input, shape index: {}]   ;;  %s1392_s2 = inlined_call_operand.hbm [shape: bf16[128,256], index: 2, kind: input, shape index: {}]   ;;  %s1393_s3 = inlined_call_operand.hbm [shape: bf16[256,128], index: 3, kind: input, shape index: {}]   ;;  %s1394_s4 = inlined_call_operand.hbm [shape: bf16[128,128], index: 4, kind: output, shape index: {}]  }
   0x1   :  { %10 = vsyncpa [#allocation7], 0 }
   0x2   :  { %11 = vsyncpa [#allocation10], 0 }
   0x3   :  { %12 = vsyncpa [#allocation5], 0  ;;  %s30_s17 = sshll.u32 %s1391_s1, 4  ;;  %s1329_s18 = smov [#allocation6]   ;;  %s31_s17 = int_to_ptr.hbm [resolvable:$true] %s30_s17 }
   0x4   :  { %s32_s19 = sshll.u32 %s1329_s18, 4  ;;  %s17_s22 = sshll.u32 %s1390_s0, 4  ;;  %s33_s19 = int_to_ptr.vmem [resolvable:$true] %s32_s19  ;;  %s18_s22 = int_to_ptr.hbm [resolvable:$true] %s17_s22 }
   0x5   :  { %s1330_s23 = smov 64   ;;  %s1331_s24 = smov 4  }
   0x6   :  { %38 = dma.hbm_to_vmem [thread:$0]  %s31_s17, 1024, %s33_s19, [#allocation7], %s1330_s23, %s1330_s23, %s1331_s24  }
   0x7   :  { %s1332_s25 = smov [#allocation3]   ;;  %s43_s1 = sshll.u32 %s1392_s2, 4  ;;  %s44_s1 = int_to_ptr.hbm [resolvable:$true] %s43_s1 }
   0x8   :  { %s19_s26 = sshll.u32 %s1332_s25, 4  ;;  %s1333_s0 = smov [#allocation8]   ;;  %s20_s26 = int_to_ptr.vmem [resolvable:$true] %s19_s26 }
   0x9   :  { %25 = dma.hbm_to_vmem [thread:$0]  %s18_s22, 1024, %s20_s26, [#allocation4], %s1330_s23, %s1330_s23, %s1331_s24  }
   0xa   :  { %s45_s29 = sshll.u32 %s1333_s0, 4  ;;  %s56_s6 = sshll.u32 %s1393_s3, 4  ;;  %s46_s29 = int_to_ptr.vmem [resolvable:$true] %s45_s29  ;;  %s57_s6 = int_to_ptr.hbm [resolvable:$true] %s56_s6 }
   0xb   :  { %s1334_s7 = smov 128   ;;  %s1335_s8 = smov 8  }
   0xc   :  { %51 = dma.hbm_to_vmem [thread:$0]  %s44_s1, 2048, %s46_s29, [#allocation7], %s1334_s7, %s1334_s7, %s1335_s8  }
   0xd   :  { %s1336_s9 = smov [#allocation9]  }
   0xe   :  { %s58_s10 = sshll.u32 %s1336_s9, 4  ;;  %s59_s10 = int_to_ptr.vmem [resolvable:$true] %s58_s10 }
   0xf   :  { %64 = dma.hbm_to_vmem [thread:$0]  %s57_s6, 2048, %s59_s10, [#allocation10], %s1330_s23, %s1330_s23, %s1331_s24  }
  0x10   :  { %1321 = dma.done.wait [#allocation4], 1024  }
  0x11   :  { %1322 = vsyncadd [#allocation4], 4294966272 }
  0x12   :  { %1323 = dma.done.wait [#allocation7], 3072  }
  0x13   :  { %1324 = vsyncadd [#allocation7], 4294964224 }
  0x14   :  { %1325 = dma.done.wait [#allocation10], 2048  }
  0x15   :  { %1326 = vsyncadd [#allocation10], 4294965248  ;;  %v1080_v0 = vld [vmem:[#allocation6 + $0x38] sm:$0xff]  ;;  %v1079_v1 = vld [vmem:[#allocation6 + $0x30] sm:$0xff]  ;;  %s1337_s2 = smov [#allocation11]   ;;  %s864_s13 = sshll.u32 %s1394_s4, 4  ;;  %s865_s13 = int_to_ptr.hbm [resolvable:$true] %s864_s13 }
  0x16   :  { %250 = vmatpush.bf16.msra.mxu0 %v1080_v0  ;;  %1168 = vmatpush.bf16.msra.mxu1 %v1080_v0  ;;  %v1078_v2 = vld [vmem:[#allocation6 + $0x28] sm:$0xff]  ;;  %v1077_v3 = vld [vmem:[#allocation6 + $0x20] sm:$0xff]  ;;  %v1076_v4 = vld [vmem:[#allocation6 + $0x18] sm:$0xff]  ;;  %s862_s3 = sshll.u32 %s1337_s2, 4  ;;  %s863_s3 = int_to_ptr.vmem [resolvable:$true] %s862_s3 }
  0x17   :  { %1169 = vmatpush.bf16.msra.mxu2 %v1080_v0  ;;  %1170 = vmatpush.bf16.msra.mxu3 %v1080_v0  ;;  %v1075_v5 = vld [vmem:[#allocation6 + $0x10] sm:$0xff]  ;;  %v1074_v6 = vld [vmem:[#allocation6 + $0x8] sm:$0xff]  ;;  %v1104_v8 = vld [vmem:[#allocation8 + $0x74] sm:$0xf0] }
  0x18   :  { %v1003_v7 = vld [vmem:[#allocation8 + $0x70] sm:$0xf]  ;;  %v1103_v9 = vld [vmem:[#allocation8 + $0x74] sm:$0xf]  ;;  %v1005_v10 = vld [vmem:[#allocation8 + $0x78] sm:$0xf0] }
  0x19   :  { %v1073_v11 = vld [vmem:[#allocation6] sm:$0xff]  ;;  %v1083_v13 = vld [vmem:[#allocation3 + $0x10] sm:$0xff]  ;;  %v1004_v14 = vor.u32 %v1104_v8, %v1003_v7  ;;  %v1008_v15 = vor.u32 %v1103_v9, %v1005_v10  ;;  %v1102_v17 = vld [vmem:[#allocation8 + $0x64] sm:$0xf0] }
  0x1a   :  { %251 = vmatpush.bf16.msra.mxu0 %v1079_v1  ;;  %1171 = vmatpush.bf16.msra.mxu1 %v1079_v1  ;;  %v1081_v12 = vld [vmem:[#allocation3] sm:$0xff]  ;;  %v997_v19 = vld [vmem:[#allocation8 + $0x68] sm:$0xf0]  ;;  %v1087_v21 = vld [vmem:[#allocation3 + $0x30] sm:$0xff] }
  0x1b   :  { %1172 = vmatpush.bf16.msra.mxu2 %v1079_v1  ;;  %1173 = vmatpush.bf16.msra.mxu3 %v1079_v1  ;;  %v995_v16 = vld [vmem:[#allocation8 + $0x60] sm:$0xf]  ;;  %v1101_v18 = vld [vmem:[#allocation8 + $0x64] sm:$0xf]  ;;  %v987_v24 = vld [vmem:[#allocation8 + $0x50] sm:$0xf] }
  0x1c   :  { %v1085_v20 = vld [vmem:[#allocation3 + $0x20] sm:$0xff]  ;;  %v996_v22 = vor.u32 %v1102_v17, %v995_v16  ;;  %v1000_v23 = vor.u32 %v1101_v18, %v997_v19  ;;  %v1100_v25 = vld [vmem:[#allocation8 + $0x54] sm:$0xf0]  ;;  %v1099_v26 = vld [vmem:[#allocation8 + $0x54] sm:$0xf] }
  0x1d   :  { %v989_v27 = vld [vmem:[#allocation8 + $0x58] sm:$0xf0]  ;;  %v988_v28 = vor.u32 %v1100_v25, %v987_v24  ;;  %v979_v30 = vld [vmem:[#allocation8 + $0x40] sm:$0xf]  ;;  %v1098_v31 = vld [vmem:[#allocation8 + $0x44] sm:$0xf0] }
  0x1e   :  { %252 = vmatpush.bf16.msra.mxu0 %v1078_v2  ;;  %1174 = vmatpush.bf16.msra.mxu1 %v1078_v2  ;;  %v992_v29 = vor.u32 %v1099_v26, %v989_v27  ;;  %v1097_v32 = vld [vmem:[#allocation8 + $0x44] sm:$0xf]  ;;  %v981_v33 = vld [vmem:[#allocation8 + $0x48] sm:$0xf0]  ;;  %v980_v34 = vor.u32 %v1098_v31, %v979_v30  ;;  %v971_v36 = vld [vmem:[#allocation8 + $0x30] sm:$0xf] }
  0x1f   :  { %1175 = vmatpush.bf16.msra.mxu2 %v1078_v2  ;;  %1176 = vmatpush.bf16.msra.mxu3 %v1078_v2  ;;  %v984_v35 = vor.u32 %v1097_v32, %v981_v33  ;;  %v1096_v37 = vld [vmem:[#allocation8 + $0x34] sm:$0xf0]  ;;  %v1095_v38 = vld [vmem:[#allocation8 + $0x34] sm:$0xf]  ;;  %v973_v39 = vld [vmem:[#allocation8 + $0x38] sm:$0xf0] }
  0x20   :  { %v1082_v40 = vld [vmem:[#allocation3 + $0x8] sm:$0xff]  ;;  %v1084_v41 = vld [vmem:[#allocation3 + $0x18] sm:$0xff]  ;;  %v972_v42 = vor.u32 %v1096_v37, %v971_v36  ;;  %v976_v43 = vor.u32 %v1095_v38, %v973_v39  ;;  %v963_v44 = vld [vmem:[#allocation8 + $0x20] sm:$0xf] }
  0x21   :  { %v1094_v45 = vld [vmem:[#allocation8 + $0x24] sm:$0xf0]  ;;  %v1093_v46 = vld [vmem:[#allocation8 + $0x24] sm:$0xf]  ;;  %v965_v47 = vld [vmem:[#allocation8 + $0x28] sm:$0xf0] }
  0x22   :  { %253 = vmatpush.bf16.msra.mxu0 %v1077_v3  ;;  %1177 = vmatpush.bf16.msra.mxu1 %v1077_v3  ;;  %v1086_v48 = vld [vmem:[#allocation3 + $0x28] sm:$0xff]  ;;  %v1088_v49 = vld [vmem:[#allocation3 + $0x38] sm:$0xff]  ;;  %v964_v50 = vor.u32 %v1094_v45, %v963_v44  ;;  %v968_v51 = vor.u32 %v1093_v46, %v965_v47  ;;  %v955_v52 = vld [vmem:[#allocation8 + $0x10] sm:$0xf] }
  0x23   :  { %1178 = vmatpush.bf16.msra.mxu2 %v1077_v3  ;;  %1179 = vmatpush.bf16.msra.mxu3 %v1077_v3  ;;  %v1092_v53 = vld [vmem:[#allocation8 + $0x14] sm:$0xf0]  ;;  %v1091_v54 = vld [vmem:[#allocation8 + $0x14] sm:$0xf]  ;;  %v957_v56 = vld [vmem:[#allocation8 + $0x18] sm:$0xf0] }
  0x24   :  { %v956_v55 = vor.u32 %v1092_v53, %v955_v52  ;;  %v947_v57 = vld [vmem:[#allocation8] sm:$0xf]  ;;  %v1090_v58 = vld [vmem:[#allocation8 + $0x4] sm:$0xf0]  ;;  %v960_v59 = vor.u32 %v1091_v54, %v957_v56  ;;  %v1089_v60 = vld [vmem:[#allocation8 + $0x4] sm:$0xf] }
  0x25   :  { %v949_v61 = vld [vmem:[#allocation8 + $0x8] sm:$0xf0]  ;;  %v948_v62 = vor.u32 %v1090_v58, %v947_v57  ;;  %v1111_v17 = vld [vmem:[#allocation9 + $0x30] sm:$0xff]  ;;  %v1109_v24 = vld [vmem:[#allocation9 + $0x20] sm:$0xff] }
  0x26   :  { %254 = vmatpush.bf16.msra.mxu0 %v1076_v4  ;;  %1180 = vmatpush.bf16.msra.mxu1 %v1076_v4  ;;  %v952_v63 = vor.u32 %v1089_v60, %v949_v61  ;;  %v1118_v25 = vld [vmem:[#allocation9 + $0x68] sm:$0xff]  ;;  %v1108_v26 = vld [vmem:[#allocation9 + $0x18] sm:$0xff]  ;;  %v1113_v38 = vld [vmem:[#allocation9 + $0x40] sm:$0xff] }
  0x27   :  { %1181 = vmatpush.bf16.msra.mxu2 %v1076_v4  ;;  %1182 = vmatpush.bf16.msra.mxu3 %v1076_v4  ;;  %v1116_v31 = vld [vmem:[#allocation9 + $0x58] sm:$0xff]  ;;  %v1106_v32 = vld [vmem:[#allocation9 + $0x8] sm:$0xff] }
  0x28   :  { %v1114_v36 = vld [vmem:[#allocation9 + $0x48] sm:$0xff] }
  0x2a   :  { %255 = vmatpush.bf16.msra.mxu0 %v1075_v5  ;;  %1183 = vmatpush.bf16.msra.mxu1 %v1075_v5 }
  0x2b   :  { %1184 = vmatpush.bf16.msra.mxu2 %v1075_v5  ;;  %1185 = vmatpush.bf16.msra.mxu3 %v1075_v5 }
  0x2e   :  { %256 = vmatpush.bf16.msra.mxu0 %v1074_v6  ;;  %1186 = vmatpush.bf16.msra.mxu1 %v1074_v6 }
  0x2f   :  { %1187 = vmatpush.bf16.msra.mxu2 %v1074_v6  ;;  %1188 = vmatpush.bf16.msra.mxu3 %v1074_v6 }
  0x32   :  { %257 = vmatpush.bf16.msra.mxu0 %v1073_v11  ;;  %1189 = vmatpush.bf16.msra.mxu1 %v1073_v11 }
  0x33   :  { %1190 = vmatpush.bf16.msra.mxu2 %v1073_v11  ;;  %1191 = vmatpush.bf16.msra.mxu3 %v1073_v11 }
  0x35   :  { %258 = vmatmul.bf16.vlgmr.msra.gmra.mxu0 %v1081_v12  ;;  %268 = vmatmul.bf16.vlgmr.msra.gmra.mxu1 %v1083_v13 }
  0x36   :  { %454 = vmatpush.bf16.msrb.mxu1 %v1004_v14  ;;  %278 = vmatmul.bf16.vlgmr.msra.gmra.mxu2 %v1085_v20 }
  0x37   :  { %503 = vmatpush.bf16.msrb.mxu2 %v1008_v15  ;;  %288 = vmatmul.bf16.vlgmr.msra.gmra.mxu3 %v1087_v21  ;;  %v1112_v15 = vld [vmem:[#allocation9 + $0x38] sm:$0xff] }
  0x38   :  { %728 = vmatpush.bf16.msrb.mxu3 %v1112_v15  ;;  %v1120_v21 = vld [vmem:[#allocation9 + $0x78] sm:$0xff] }
  0x39   :  { %777 = vmatpush.bf16.msrb.mxu0 %v1120_v21 }
  0x3a   :  { %455 = vmatpush.bf16.msrb.mxu1 %v996_v22  ;;  %v1110_v22 = vld [vmem:[#allocation9 + $0x28] sm:$0xff] }
  0x3b   :  { %504 = vmatpush.bf16.msrb.mxu2 %v1000_v23  ;;  %v1119_v23 = vld [vmem:[#allocation9 + $0x70] sm:$0xff] }
  0x3c   :  { %729 = vmatpush.bf16.msrb.mxu3 %v1111_v17 }
  0x3d   :  { %778 = vmatpush.bf16.msrb.mxu0 %v1119_v23 }
  0x3e   :  { %456 = vmatpush.bf16.msrb.mxu1 %v988_v28  ;;  %v1117_v28 = vld [vmem:[#allocation9 + $0x60] sm:$0xff] }
  0x3f   :  { %505 = vmatpush.bf16.msrb.mxu2 %v992_v29  ;;  %v1107_v29 = vld [vmem:[#allocation9 + $0x10] sm:$0xff] }
  0x40   :  { %730 = vmatpush.bf16.msrb.mxu3 %v1110_v22 }
  0x41   :  { %779 = vmatpush.bf16.msrb.mxu0 %v1118_v25 }
  0x42   :  { %457 = vmatpush.bf16.msrb.mxu1 %v980_v34  ;;  %v1115_v34 = vld [vmem:[#allocation9 + $0x50] sm:$0xff] }
  0x43   :  { %506 = vmatpush.bf16.msrb.mxu2 %v984_v35  ;;  %v1105_v35 = vld [vmem:[#allocation9] sm:$0xff] }
  0x44   :  { %731 = vmatpush.bf16.msrb.mxu3 %v1109_v24 }
  0x45   :  { %263 = vmatmul.bf16.gmra.mxu0 %v1082_v40  ;;  %273 = vmatmul.bf16.gmra.mxu1 %v1084_v41 }
  0x46   :  { %458 = vmatpush.bf16.msrb.mxu1 %v972_v42  ;;  %283 = vmatmul.bf16.gmra.mxu2 %v1086_v48 }
  0x47   :  { %507 = vmatpush.bf16.msrb.mxu2 %v976_v43  ;;  %293 = vmatmul.bf16.gmra.mxu3 %v1088_v49 }
  0x48   :  { %732 = vmatpush.bf16.msrb.mxu3 %v1108_v26  ;;  %780 = vmatpush.bf16.msrb.mxu0 %v1117_v28 }
  0x4a   :  { %459 = vmatpush.bf16.msrb.mxu1 %v964_v50 }
  0x4b   :  { %508 = vmatpush.bf16.msrb.mxu2 %v968_v51 }
  0x4c   :  { %733 = vmatpush.bf16.msrb.mxu3 %v1107_v29  ;;  %781 = vmatpush.bf16.msrb.mxu0 %v1116_v31 }
  0x4e   :  { %460 = vmatpush.bf16.msrb.mxu1 %v956_v55 }
  0x4f   :  { %509 = vmatpush.bf16.msrb.mxu2 %v960_v59 }
  0x50   :  { %734 = vmatpush.bf16.msrb.mxu3 %v1106_v32  ;;  %782 = vmatpush.bf16.msrb.mxu0 %v1115_v34 }
  0x52   :  { %461 = vmatpush.bf16.msrb.mxu1 %v948_v62 }
  0x53   :  { %510 = vmatpush.bf16.msrb.mxu2 %v952_v63 }
  0x54   :  { %735 = vmatpush.bf16.msrb.mxu3 %v1105_v35  ;;  %783 = vmatpush.bf16.msrb.mxu0 %v1114_v36 }
  0x58   :  { %784 = vmatpush.bf16.msrb.mxu0 %v1113_v38 }
  0xb2   :  { %v259_v0 = vpop.f32.mrf.mxu0  ;;  %v269_v5 = vpop.f32.mrf.mxu1 }
  0xb9   :  { %v279_v11 = vpop.f32.mrf.mxu2 }
  0xba   :  { %v261_v1 = vpop.f32.mrf.mxu0  ;;  %v271_v7 = vpop.f32.mrf.mxu1 }
  0xbb   :  { %v366_v2 = vpack.c.bf16 %v261_v1, %v259_v0  ;;  %v368_v8 = vpack.c.bf16 %v271_v7, %v269_v5  ;;  %v289_v19 = vpop.f32.mrf.mxu3 }
  0xbd   :  { %462 = vmatmul.bf16.vlgmr.msrb.gmra.mxu1 %v366_v2  ;;  %511 = vmatmul.bf16.vlgmr.msrb.gmra.mxu2 %v366_v2 }
  0xc1   :  { %v281_v13 = vpop.f32.mrf.mxu2 }
  0xc2   :  { %v264_v3 = vpop.f32.mrf.mxu0  ;;  %v274_v9 = vpop.f32.mrf.mxu1  ;;  %v370_v14 = vpack.c.bf16 %v281_v13, %v279_v11 }
  0xc3   :  { %v291_v27 = vpop.f32.mrf.mxu3 }
  0xc4   :  { %v372_v30 = vpack.c.bf16 %v291_v27, %v289_v19 }
  0xc9   :  { %v284_v16 = vpop.f32.mrf.mxu2 }
  0xca   :  { %v266_v4 = vpop.f32.mrf.mxu0  ;;  %v276_v10 = vpop.f32.mrf.mxu1 }
  0xcb   :  { %v367_v6 = vpack.c.bf16 %v266_v4, %v264_v3  ;;  %v369_v12 = vpack.c.bf16 %v276_v10, %v274_v9  ;;  %v294_v33 = vpop.f32.mrf.mxu3 }
  0xcd   :  { %467 = vmatmul.bf16.gmra.mxu1 %v367_v6  ;;  %516 = vmatmul.bf16.gmra.mxu2 %v367_v6 }
  0xd1   :  { %v286_v18 = vpop.f32.mrf.mxu2 }
  0xd2   :  { %v371_v20 = vpack.c.bf16 %v286_v18, %v284_v16 }
  0xd3   :  { %v296_v37 = vpop.f32.mrf.mxu3 }
  0xd4   :  { %v373_v39 = vpack.c.bf16 %v296_v37, %v294_v33 }
  0xdd   :  { %472 = vmatmul.bf16.gmra.mxu1 %v368_v8  ;;  %521 = vmatmul.bf16.gmra.mxu2 %v368_v8 }
  0xed   :  { %477 = vmatmul.bf16.gmra.mxu1 %v369_v12  ;;  %526 = vmatmul.bf16.gmra.mxu2 %v369_v12 }
  0xfd   :  { %482 = vmatmul.bf16.gmra.mxu1 %v370_v14  ;;  %531 = vmatmul.bf16.gmra.mxu2 %v370_v14 }
 0x10d   :  { %487 = vmatmul.bf16.gmra.mxu1 %v371_v20  ;;  %536 = vmatmul.bf16.gmra.mxu2 %v371_v20 }
 0x11d   :  { %492 = vmatmul.bf16.gmra.mxu1 %v372_v30  ;;  %541 = vmatmul.bf16.gmra.mxu2 %v372_v30 }
 0x12d   :  { %497 = vmatmul.bf16.gmra.mxu1 %v373_v39  ;;  %546 = vmatmul.bf16.gmra.mxu2 %v373_v39 }
 0x13a   :  { %v463_v40 = vpop.f32.mrf.mxu1 }
 0x13b   :  { %v552_v43 = vmax.f32 %v463_v40, 0.0 }
 0x140   :  { %v512_v41 = vpop.f32.mrf.mxu2 }
 0x141   :  { %v553_v47 = vmax.f32 %v512_v41, 0.0 }
 0x142   :  { %v465_v42 = vpop.f32.mrf.mxu1 }
 0x143   :  { %v554_v44 = vmax.f32 %v465_v42, 0.0 }
 0x145   :  { %v616_v45 = vpack.c.bf16 %v554_v44, %v552_v43 }
 0x147   :  { %736 = vmatmul.bf16.vlgmr.msrb.gmra.mxu3 %v616_v45 }
 0x148   :  { %v514_v46 = vpop.f32.mrf.mxu2 }
 0x149   :  { %v555_v48 = vmax.f32 %v514_v46, 0.0 }
 0x14a   :  { %v468_v49 = vpop.f32.mrf.mxu1 }
 0x14b   :  { %v617_v50 = vpack.c.bf16 %v555_v48, %v553_v47  ;;  %v556_v53 = vmax.f32 %v468_v49, 0.0 }
 0x14d   :  { %785 = vmatmul.bf16.vlgmr.msrb.gmra.mxu0 %v617_v50 }
 0x150   :  { %v517_v51 = vpop.f32.mrf.mxu2 }
 0x151   :  { %v557_v57 = vmax.f32 %v517_v51, 0.0 }
 0x152   :  { %v470_v52 = vpop.f32.mrf.mxu1 }
 0x153   :  { %v558_v54 = vmax.f32 %v470_v52, 0.0 }
 0x155   :  { %v618_v55 = vpack.c.bf16 %v558_v54, %v556_v53 }
 0x157   :  { %741 = vmatmul.bf16.gmra.mxu3 %v618_v55 }
 0x158   :  { %v519_v56 = vpop.f32.mrf.mxu2 }
 0x159   :  { %v559_v58 = vmax.f32 %v519_v56, 0.0 }
 0x15a   :  { %v473_v59 = vpop.f32.mrf.mxu1 }
 0x15b   :  { %v619_v60 = vpack.c.bf16 %v559_v58, %v557_v57  ;;  %v560_v63 = vmax.f32 %v473_v59, 0.0 }
 0x15d   :  { %790 = vmatmul.bf16.gmra.mxu0 %v619_v60 }
 0x160   :  { %v522_v61 = vpop.f32.mrf.mxu2 }
 0x161   :  { %v561_v3 = vmax.f32 %v522_v61, 0.0 }
 0x162   :  { %v475_v62 = vpop.f32.mrf.mxu1 }
 0x163   :  { %v562_v0 = vmax.f32 %v475_v62, 0.0 }
 0x165   :  { %v620_v1 = vpack.c.bf16 %v562_v0, %v560_v63 }
 0x167   :  { %746 = vmatmul.bf16.gmra.mxu3 %v620_v1 }
 0x168   :  { %v524_v2 = vpop.f32.mrf.mxu2 }
 0x169   :  { %v563_v4 = vmax.f32 %v524_v2, 0.0 }
 0x16a   :  { %v478_v5 = vpop.f32.mrf.mxu1 }
 0x16b   :  { %v621_v6 = vpack.c.bf16 %v563_v4, %v561_v3  ;;  %v564_v9 = vmax.f32 %v478_v5, 0.0 }
 0x16d   :  { %795 = vmatmul.bf16.gmra.mxu0 %v621_v6 }
 0x170   :  { %v527_v7 = vpop.f32.mrf.mxu2 }
 0x171   :  { %v565_v13 = vmax.f32 %v527_v7, 0.0 }
 0x172   :  { %v480_v8 = vpop.f32.mrf.mxu1 }
 0x173   :  { %v566_v10 = vmax.f32 %v480_v8, 0.0 }
 0x175   :  { %v622_v11 = vpack.c.bf16 %v566_v10, %v564_v9 }
 0x177   :  { %751 = vmatmul.bf16.gmra.mxu3 %v622_v11 }
 0x178   :  { %v529_v12 = vpop.f32.mrf.mxu2 }
 0x179   :  { %v567_v14 = vmax.f32 %v529_v12, 0.0 }
 0x17a   :  { %v483_v15 = vpop.f32.mrf.mxu1 }
 0x17b   :  { %v623_v16 = vpack.c.bf16 %v567_v14, %v565_v13  ;;  %v568_v19 = vmax.f32 %v483_v15, 0.0 }
 0x17d   :  { %800 = vmatmul.bf16.gmra.mxu0 %v623_v16 }
 0x180   :  { %v532_v17 = vpop.f32.mrf.mxu2 }
 0x181   :  { %v569_v23 = vmax.f32 %v532_v17, 0.0 }
 0x182   :  { %v485_v18 = vpop.f32.mrf.mxu1 }
 0x183   :  { %v570_v20 = vmax.f32 %v485_v18, 0.0 }
 0x185   :  { %v624_v21 = vpack.c.bf16 %v570_v20, %v568_v19 }
 0x187   :  { %756 = vmatmul.bf16.gmra.mxu3 %v624_v21 }
 0x188   :  { %v534_v22 = vpop.f32.mrf.mxu2 }
 0x189   :  { %v571_v24 = vmax.f32 %v534_v22, 0.0 }
 0x18a   :  { %v488_v25 = vpop.f32.mrf.mxu1 }
 0x18b   :  { %v625_v26 = vpack.c.bf16 %v571_v24, %v569_v23  ;;  %v572_v29 = vmax.f32 %v488_v25, 0.0 }
 0x18d   :  { %805 = vmatmul.bf16.gmra.mxu0 %v625_v26 }
 0x190   :  { %v537_v27 = vpop.f32.mrf.mxu2 }
 0x191   :  { %v573_v33 = vmax.f32 %v537_v27, 0.0 }
 0x192   :  { %v490_v28 = vpop.f32.mrf.mxu1 }
 0x193   :  { %v574_v30 = vmax.f32 %v490_v28, 0.0 }
 0x195   :  { %v626_v31 = vpack.c.bf16 %v574_v30, %v572_v29 }
 0x197   :  { %761 = vmatmul.bf16.gmra.mxu3 %v626_v31 }
 0x198   :  { %v539_v32 = vpop.f32.mrf.mxu2 }
 0x199   :  { %v575_v34 = vmax.f32 %v539_v32, 0.0 }
 0x19a   :  { %v493_v35 = vpop.f32.mrf.mxu1 }
 0x19b   :  { %v627_v36 = vpack.c.bf16 %v575_v34, %v573_v33  ;;  %v576_v39 = vmax.f32 %v493_v35, 0.0 }
 0x19d   :  { %810 = vmatmul.bf16.gmra.mxu0 %v627_v36 }
 0x1a0   :  { %v542_v37 = vpop.f32.mrf.mxu2 }
 0x1a1   :  { %v577_v43 = vmax.f32 %v542_v37, 0.0 }
 0x1a2   :  { %v495_v38 = vpop.f32.mrf.mxu1 }
 0x1a3   :  { %v578_v40 = vmax.f32 %v495_v38, 0.0 }
 0x1a5   :  { %v628_v41 = vpack.c.bf16 %v578_v40, %v576_v39 }
 0x1a7   :  { %766 = vmatmul.bf16.gmra.mxu3 %v628_v41 }
 0x1a8   :  { %v544_v42 = vpop.f32.mrf.mxu2 }
 0x1a9   :  { %v579_v44 = vmax.f32 %v544_v42, 0.0 }
 0x1aa   :  { %v498_v45 = vpop.f32.mrf.mxu1 }
 0x1ab   :  { %v629_v46 = vpack.c.bf16 %v579_v44, %v577_v43  ;;  %v580_v49 = vmax.f32 %v498_v45, 0.0 }
 0x1ad   :  { %815 = vmatmul.bf16.gmra.mxu0 %v629_v46 }
 0x1b0   :  { %v547_v47 = vpop.f32.mrf.mxu2 }
 0x1b1   :  { %v581_v53 = vmax.f32 %v547_v47, 0.0 }
 0x1b2   :  { %v500_v48 = vpop.f32.mrf.mxu1 }
 0x1b3   :  { %v582_v50 = vmax.f32 %v500_v48, 0.0 }
 0x1b5   :  { %v630_v51 = vpack.c.bf16 %v582_v50, %v580_v49 }
 0x1b7   :  { %771 = vmatmul.bf16.gmra.mxu3 %v630_v51 }
 0x1b8   :  { %v549_v52 = vpop.f32.mrf.mxu2 }
 0x1b9   :  { %v583_v54 = vmax.f32 %v549_v52, 0.0 }
 0x1bb   :  { %v631_v55 = vpack.c.bf16 %v583_v54, %v581_v53 }
 0x1bd   :  { %820 = vmatmul.bf16.gmra.mxu0 %v631_v55 }
 0x1ca   :  { %v737_v56 = vpop.f32.mrf.mxu3  ;;  %v786_v57 = vpop.f32.mrf.mxu0 }
 0x1cb   :  { %v787_v60 = vadd.f32 %v786_v57, %v737_v56 }
 0x1d2   :  { %v739_v58 = vpop.f32.mrf.mxu3  ;;  %v788_v59 = vpop.f32.mrf.mxu0 }
 0x1d3   :  { %v789_v61 = vadd.f32 %v788_v59, %v739_v58 }
 0x1d5   :  { %v1124_v62 = vpack.c.bf16 %v789_v61, %v787_v60 }
 0x1d7   :  { %1125 = vst [vmem:[#allocation11] sm:$0xff] %v1124_v62  }
 0x1da   :  { %v742_v63 = vpop.f32.mrf.mxu3  ;;  %v791_v0 = vpop.f32.mrf.mxu0 }
 0x1db   :  { %v792_v3 = vadd.f32 %v791_v0, %v742_v63 }
 0x1e2   :  { %v744_v1 = vpop.f32.mrf.mxu3  ;;  %v793_v2 = vpop.f32.mrf.mxu0 }
 0x1e3   :  { %v794_v4 = vadd.f32 %v793_v2, %v744_v1 }
 0x1e5   :  { %v1129_v5 = vpack.c.bf16 %v794_v4, %v792_v3 }
 0x1e7   :  { %1161 = vst [vmem:[#allocation11 + $0x8] sm:$0xff] %v1129_v5  }
 0x1ea   :  { %v747_v6 = vpop.f32.mrf.mxu3  ;;  %v796_v7 = vpop.f32.mrf.mxu0 }
 0x1eb   :  { %v797_v10 = vadd.f32 %v796_v7, %v747_v6 }
 0x1f2   :  { %v749_v8 = vpop.f32.mrf.mxu3  ;;  %v798_v9 = vpop.f32.mrf.mxu0 }
 0x1f3   :  { %v799_v11 = vadd.f32 %v798_v9, %v749_v8 }
 0x1f5   :  { %v1134_v12 = vpack.c.bf16 %v799_v11, %v797_v10 }
 0x1f7   :  { %1162 = vst [vmem:[#allocation11 + $0x10] sm:$0xff] %v1134_v12  }
 0x1fa   :  { %v752_v13 = vpop.f32.mrf.mxu3  ;;  %v801_v14 = vpop.f32.mrf.mxu0 }
 0x1fb   :  { %v802_v17 = vadd.f32 %v801_v14, %v752_v13 }
 0x202   :  { %v754_v15 = vpop.f32.mrf.mxu3  ;;  %v803_v16 = vpop.f32.mrf.mxu0 }
 0x203   :  { %v804_v18 = vadd.f32 %v803_v16, %v754_v15 }
 0x205   :  { %v1139_v19 = vpack.c.bf16 %v804_v18, %v802_v17 }
 0x207   :  { %1163 = vst [vmem:[#allocation11 + $0x18] sm:$0xff] %v1139_v19  }
 0x20a   :  { %v757_v20 = vpop.f32.mrf.mxu3  ;;  %v806_v21 = vpop.f32.mrf.mxu0 }
 0x20b   :  { %v807_v24 = vadd.f32 %v806_v21, %v757_v20 }
 0x212   :  { %v759_v22 = vpop.f32.mrf.mxu3  ;;  %v808_v23 = vpop.f32.mrf.mxu0 }
 0x213   :  { %v809_v25 = vadd.f32 %v808_v23, %v759_v22 }
 0x215   :  { %v1144_v26 = vpack.c.bf16 %v809_v25, %v807_v24 }
 0x217   :  { %1164 = vst [vmem:[#allocation11 + $0x20] sm:$0xff] %v1144_v26  }
 0x21a   :  { %v762_v27 = vpop.f32.mrf.mxu3  ;;  %v811_v28 = vpop.f32.mrf.mxu0 }
 0x21b   :  { %v812_v31 = vadd.f32 %v811_v28, %v762_v27 }
 0x222   :  { %v764_v29 = vpop.f32.mrf.mxu3  ;;  %v813_v30 = vpop.f32.mrf.mxu0 }
 0x223   :  { %v814_v32 = vadd.f32 %v813_v30, %v764_v29 }
 0x225   :  { %v1149_v33 = vpack.c.bf16 %v814_v32, %v812_v31 }
 0x227   :  { %1165 = vst [vmem:[#allocation11 + $0x28] sm:$0xff] %v1149_v33  }
 0x22a   :  { %v767_v34 = vpop.f32.mrf.mxu3  ;;  %v816_v35 = vpop.f32.mrf.mxu0 }
 0x22b   :  { %v817_v38 = vadd.f32 %v816_v35, %v767_v34 }
 0x232   :  { %v769_v36 = vpop.f32.mrf.mxu3  ;;  %v818_v37 = vpop.f32.mrf.mxu0 }
 0x233   :  { %v819_v39 = vadd.f32 %v818_v37, %v769_v36 }
 0x235   :  { %v1154_v40 = vpack.c.bf16 %v819_v39, %v817_v38 }
 0x237   :  { %1166 = vst [vmem:[#allocation11 + $0x30] sm:$0xff] %v1154_v40  }
 0x23a   :  { %v772_v41 = vpop.f32.mrf.mxu3  ;;  %v821_v42 = vpop.f32.mrf.mxu0 }
 0x23b   :  { %v822_v45 = vadd.f32 %v821_v42, %v772_v41 }
 0x242   :  { %v774_v43 = vpop.f32.mrf.mxu3  ;;  %v823_v44 = vpop.f32.mrf.mxu0 }
 0x243   :  { %v824_v46 = vadd.f32 %v823_v44, %v774_v43 }
 0x245   :  { %v1159_v47 = vpack.c.bf16 %v824_v46, %v822_v45 }
 0x247   :  { %1167 = vst [vmem:[#allocation11 + $0x38] sm:$0xff] %v1159_v47  }
 0x248   :  { %870 = dma.vmem_to_hbm [thread:$0]  %s863_s3, 1024, %s865_s13, [#allocation5], %s1330_s23, %s1330_s23, %s1331_s24  }
 0x249   :  { %1327 = dma.done.wait [#allocation5], 1024  }
 0x24a   :  { %1328 = vsyncadd [#allocation5], 4294966272 }
 0x24b   :  { %875 = vsyncpa [#allocation4], 1 }
 0x24c   :  { %876 = vsyncpa [#allocation7], 1 }
 0x24d   :  { %877 = vsyncpa [#allocation10], 1 }
 0x24e   :  { %878 = vsyncpa [#allocation5], 1 }

</bundles_post_ra>
